<compile_context>
chip_gen: v7x
topology: tpu7x:2x2x1
jax: 0.10.0
libtpu: 0.0.40
codegen_flags: <defaults>
</compile_context>

<pallas_src>
import jax
import jax.numpy as jnp
from jax.experimental import pallas as pl
from jax.experimental.pallas import tpu as pltpu

_SUBLANE = 8  # f32 sublane granule: batch-tile rows must be a multiple of this


def _cdiv(a, b):
    return -(-a // b)


def _round_up(x, m):
    return ((x + m - 1) // m) * m


def _make_mlp_kernel(n_layers: int, compute_dtype):
    """Fused MLP kernel for `n_layers` Linear layers.

    Ref order: x, (w0, b0), (w1, b1), ..., o
    ReLU after every layer except the last (matches the PyTorch forward).
    Dropout layers have p=0.0 (module default) and are identity.
    """

    def kernel(*refs):
        x_ref = refs[0]
        o_ref = refs[-1]
        p_refs = refs[1:-1]
        h = x_ref[...]                                   # f32 activation
        for i in range(n_layers):
            w = p_refs[2 * i][...]                       # (K_i, N_i) bf16, VMEM-resident
            b = p_refs[2 * i + 1][...]                   # (1, N_i)  f32, VMEM-resident
            # bf16 operands -> native MXU rate; accumulate / bias / ReLU in f32.
            h = jnp.dot(h.astype(compute_dtype), w,
                        preferred_element_type=jnp.float32) + b
            if i < n_layers - 1:
                h = jnp.maximum(h, 0.0)                  # ReLU on input/hidden layers
            # TODO(synk): nonzero dropout_rate_ would need pltpu.prng_seed /
            # pltpu.prng_random_bits here; with the default p=0.0 it is a no-op.
        o_ref[...] = h.astype(o_ref.dtype)

    return kernel


def prepare_params(params, compute_dtype=jnp.bfloat16):
    """One-time prep: weights -> (in, out) bf16, biases stay (1, out) f32.

    No feature-dim padding: kernel blocks use the true array dims and the MXU
    pads K/N internally, so no extra HBM bytes are ever moved.
    """
    prepped = []
    for w, b in params:
        prepped.append((jnp.asarray(w, compute_dtype), jnp.asarray(b, jnp.float32)))
    return prepped


def dqn_forward(percept, prepped_params, *, batch_tile=512):
    """Run the fused DQN MLP.

    percept        : (B, dim_percept) float32, unpadded
    prepped_params : list of (W, b) from prepare_params(); W (K, N) bf16, b (1, N) f32
    batch_tile     : target rows of percept per grid step
    """
    n_layers = len(prepped_params)
    B, dim_in = percept.shape
    num_actions = prepped_params[-1][0].shape[1]
    compute_dtype = prepped_params[0][0].dtype

    # ---- batch tiling: minimal padded rows, multiple tiles for large B ----
    B8 = _round_up(B, _SUBLANE)
    n_tiles = max(1, _cdiv(B8, batch_tile))
    if n_tiles > 1 and n_tiles % 2:      # v7x megacore: prefer an even step count
        n_tiles += 1
    bt = _round_up(_cdiv(B8, n_tiles), _SUBLANE)
    n_tiles = _cdiv(B8, bt)
    B_pad = n_tiles * bt

    x = percept.astype(jnp.float32)
    if B_pad != B:
        # Only batch rows are ever padded (cheap, and zero when B % 8 == 0).
        x = jnp.zeros((B_pad, dim_in), jnp.float32).at[:B, :].set(x)

    flat_params = []
    for w, b in prepped_params:
        flat_params.extend([w, b])

    kernel = _make_mlp_kernel(n_layers, compute_dtype)

    # Percept / output tiles march along the batch grid axis; weights & biases
    # use a constant index_map => fetched once, VMEM-resident across all steps.
    x_spec = pl.BlockSpec((bt, dim_in), lambda i: (i, 0))
    out_spec = pl.BlockSpec((bt, num_actions), lambda i: (i, 0))

    def _param_spec(p):
        # Resident params never re-fetch; single-buffer the big ones so large
        # hidden widths don't double their VMEM footprint (matters on v7x).
        if p.size * p.dtype.itemsize >= (512 << 10):
            return pl.BlockSpec(p.shape, lambda i: (0, 0),
                                pipeline_mode=pl.Buffered(1))
        return pl.BlockSpec(p.shape, lambda i: (0, 0))

    param_specs = [_param_spec(p) for p in flat_params]

    # Advisory cost: weights/biases counted once (resident), x/out streamed once.
    param_bytes = sum(int(p.size) * p.dtype.itemsize for p in flat_params)
    flops = 2 * B_pad * sum(int(w.shape[0]) * int(w.shape[1])
                            for w, _ in prepped_params)
    bytes_accessed = int(B_pad * dim_in * 4 + param_bytes + B_pad * num_actions * 4)

    # Explicit scoped-VMEM limit only once the working set outgrows the
    # smallest default (16 MiB on v5e); keep below v7x's 64 MiB physical VMEM.
    max_width = max(int(w.shape[1]) for w, _ in prepped_params)
    vmem_need = (2 * bt * dim_in * 4            # double-buffered x tiles
                 + param_bytes                   # resident params
                 + 2 * bt * num_actions * 4      # double-buffered out tiles
                 + 4 * bt * max_width * 2)       # in-flight activations (headroom)
    vmem_limit = None
    if 2 * vmem_need > (16 << 20):
        vmem_limit = int(min(2 * vmem_need + (1 << 20), 48 << 20))

    out = pl.pallas_call(
        kernel,
        out_shape=jax.ShapeDtypeStruct((B_pad, num_actions), jnp.float32),
        grid=(n_tiles,),
        in_specs=[x_spec] + param_specs,
        out_specs=out_spec,
        compiler_params=pltpu.CompilerParams(
            # Batch axis is embarrassingly parallel -> shard across TCs (v7x).
            dimension_semantics=("parallel",),
            vmem_limit_bytes=vmem_limit,
        ),
        cost_estimate=pl.CostEstimate(
            flops=int(flops), transcendentals=0, bytes_accessed=bytes_accessed),
    )(x, *flat_params)

    return out[:B] if B_pad != B else out


def init_dqn_params(key, dim_percept, num_actions, dim_hidden_=(32,)):
    """Deterministic parameter init mirroring the PyTorch module.

    input / hidden layers: kaiming_uniform (fan_in, relu) -> bound = sqrt(6/fan_in)
    output layer:          PyTorch Linear default          -> bound = 1/sqrt(fan_in)
    biases:                PyTorch Linear default          -> bound = 1/sqrt(fan_in)
    Weights are stored as (in, out) (transposed w.r.t. PyTorch's (out, in)).
    """
    dims = [dim_percept] + list(dim_hidden_) + [num_actions]
    params = []
    for i in range(len(dims) - 1):
        fan_in, fan_out = dims[i], dims[i + 1]
        key, kw, kb = jax.random.split(key, 3)
        is_output = i == len(dims) - 2
        if is_output:
            w_bound = 1.0 / jnp.sqrt(fan_in)   # default nn.Linear init
        else:
            w_bound = jnp.sqrt(6.0 / fan_in)   # kaiming_uniform, relu gain
        b_bound = 1.0 / jnp.sqrt(fan_in)
        w = jax.random.uniform(kw, (fan_in, fan_out), jnp.float32,
                               minval=-w_bound, maxval=w_bound)
        b = jax.random.uniform(kb, (1, fan_out), jnp.float32,
                               minval=-b_bound, maxval=b_bound)
        params.append((w, b))
    return params


def _reference_forward(percept, params, compute_dtype=jnp.float32):
    """Pure-JAX reference for correctness checks.

    With compute_dtype=bf16 this mirrors the kernel's per-layer casting exactly
    (bf16 matmul operands, f32 accumulation / bias / ReLU).
    """
    h = percept.astype(jnp.float32)
    for i, (w, b) in enumerate(params):
        h = jnp.dot(h.astype(compute_dtype), w.astype(compute_dtype),
                    preferred_element_type=jnp.float32) + b
        if i < len(params) - 1:
            h = jnp.maximum(h, 0.0)
    return h


if __name__ == "__main__":
    B = 8              # batch of percepts
    dim_percept = 16   # percept-space dimension
    num_actions = 4    # action-space size
    dim_hidden_ = (32,)

    key = jax.random.PRNGKey(0)
    key, kx = jax.random.split(key)
    percept = jax.random.normal(kx, (B, dim_percept), dtype=jnp.float32)

    params = init_dqn_params(key, dim_percept, num_actions, dim_hidden_)
    prepped = prepare_params(params)          # one-time: bf16 weights, f32 biases

    out = dqn_forward(percept, prepped)
    out = jax.block_until_ready(out)

    ref_bf16 = _reference_forward(percept, params, jnp.bfloat16)
    ref_f32 = _reference_forward(percept, params, jnp.float32)

    assert out.shape == (B, num_actions)
    # Tight check against a reference that uses the same bf16-operand math.
    assert jnp.allclose(out, ref_bf16, atol=1e-3, rtol=1e-3), "mismatch vs bf16 reference"
    # Loose check against the full-f32 PyTorch-equivalent forward.
    assert jnp.allclose(out, ref_f32, atol=1e-1, rtol=1e-1), "mismatch vs f32 reference"

    print("KERNEL_OK")
</pallas_src>

<mosaic_0001>
module attributes {stable_mosaic.version = 11 : i64} {
  func.func @kernel(%arg0: i32, %arg1: memref<8x16xf32, #tpu.memory_space<vmem>>, %arg2: memref<16x32xbf16, #tpu.memory_space<vmem>>, %arg3: memref<1x32xf32, #tpu.memory_space<vmem>>, %arg4: memref<32x4xbf16, #tpu.memory_space<vmem>>, %arg5: memref<1x4xf32, #tpu.memory_space<vmem>>, %arg6: memref<8x4xf32, #tpu.memory_space<vmem>>) attributes {dimension_semantics = [#tpu.dimension_semantics<parallel>], iteration_bounds = array<i64: 1>, scalar_prefetch = 0 : i64, scratch_operands = 0 : i64, tpu.core_type = #tpu.core_type<tc>, window_params = [{transform_indices = @transform_0, window_bounds = array<i64: 8, 16>}, {pipeline_mode = #tpu.pipeline_mode<synchronous>, transform_indices = @transform_1, window_bounds = array<i64: 16, 32>}, {pipeline_mode = #tpu.pipeline_mode<synchronous>, transform_indices = @transform_2, window_bounds = array<i64: 1, 32>}, {pipeline_mode = #tpu.pipeline_mode<synchronous>, transform_indices = @transform_3, window_bounds = array<i64: 32, 4>}, {pipeline_mode = #tpu.pipeline_mode<synchronous>, transform_indices = @transform_4, window_bounds = array<i64: 1, 4>}, {transform_indices = @transform_5, window_bounds = array<i64: 8, 4>}]} {
    %c0 = arith.constant 0 : index
    %c0_0 = arith.constant 0 : index
    %0 = vector.load %arg1[%c0, %c0_0] : memref<8x16xf32, #tpu.memory_space<vmem>>, vector<8x16xf32>
    %c0_1 = arith.constant 0 : index
    %c0_2 = arith.constant 0 : index
    %1 = vector.load %arg2[%c0_1, %c0_2] : memref<16x32xbf16, #tpu.memory_space<vmem>>, vector<16x32xbf16>
    %c0_3 = arith.constant 0 : index
    %c0_4 = arith.constant 0 : index
    %2 = vector.load %arg3[%c0_3, %c0_4] : memref<1x32xf32, #tpu.memory_space<vmem>>, vector<1x32xf32>
    %3 = arith.truncf %0 : vector<8x16xf32> to vector<8x16xbf16>
    %cst = arith.constant dense<0.000000e+00> : vector<8x32xf32>
    %4 = tpu.matmul %3, %1, %cst {dimension_numbers = #tpu.dot_dimension_numbers<[1], [0], [0], [1], [0, 0, 1, 1], [], []>} : vector<8x16xbf16>, vector<16x32xbf16>, vector<8x32xf32> -> vector<8x32xf32>
    %5 = vector.broadcast %2 : vector<1x32xf32> to vector<8x32xf32>
    %6 = arith.addf %4, %5 : vector<8x32xf32>
    %cst_5 = arith.constant 0.000000e+00 : f32
    %7 = vector.broadcast %cst_5 : f32 to vector<8x32xf32>
    %8 = arith.maximumf %6, %7 : vector<8x32xf32>
    %c0_6 = arith.constant 0 : index
    %c0_7 = arith.constant 0 : index
    %9 = vector.load %arg4[%c0_6, %c0_7] : memref<32x4xbf16, #tpu.memory_space<vmem>>, vector<32x4xbf16>
    %c0_8 = arith.constant 0 : index
    %c0_9 = arith.constant 0 : index
    %10 = vector.load %arg5[%c0_8, %c0_9] : memref<1x4xf32, #tpu.memory_space<vmem>>, vector<1x4xf32>
    %11 = arith.truncf %8 : vector<8x32xf32> to vector<8x32xbf16>
    %cst_10 = arith.constant dense<0.000000e+00> : vector<8x4xf32>
    %12 = tpu.matmul %11, %9, %cst_10 {dimension_numbers = #tpu.dot_dimension_numbers<[1], [0], [0], [1], [0, 0, 1, 1], [], []>} : vector<8x32xbf16>, vector<32x4xbf16>, vector<8x4xf32> -> vector<8x4xf32>
    %13 = vector.broadcast %10 : vector<1x4xf32> to vector<8x4xf32>
    %14 = arith.addf %12, %13 : vector<8x4xf32>
    %c0_11 = arith.constant 0 : index
    %c0_12 = arith.constant 0 : index
    %15 = vector.load %arg6[%c0_11, %c0_12] : memref<8x4xf32, #tpu.memory_space<vmem>>, vector<8x4xf32>
    tpu.vector_store %arg6[%c0_11, %c0_12], %14 {strides = array<i32>} : memref<8x4xf32, #tpu.memory_space<vmem>>, vector<8x4xf32>,
    return
  }
  func.func @transform_0(%arg0: i32) -> (i32, i32) {
    %c0_i32 = arith.constant 0 : i32
    %c0_i32_0 = arith.constant 0 : i32
    return %arg0, %c0_i32 : i32, i32
  }
  func.func @transform_1(%arg0: i32) -> (i32, i32) {
    %c0_i32 = arith.constant 0 : i32
    %c0_i32_0 = arith.constant 0 : i32
    %c0_i32_1 = arith.constant 0 : i32
    return %c0_i32, %c0_i32_0 : i32, i32
  }
  func.func @transform_2(%arg0: i32) -> (i32, i32) {
    %c0_i32 = arith.constant 0 : i32
    %c0_i32_0 = arith.constant 0 : i32
    %c0_i32_1 = arith.constant 0 : i32
    return %c0_i32, %c0_i32_0 : i32, i32
  }
  func.func @transform_3(%arg0: i32) -> (i32, i32) {
    %c0_i32 = arith.constant 0 : i32
    %c0_i32_0 = arith.constant 0 : i32
    %c0_i32_1 = arith.constant 0 : i32
    return %c0_i32, %c0_i32_0 : i32, i32
  }
  func.func @transform_4(%arg0: i32) -> (i32, i32) {
    %c0_i32 = arith.constant 0 : i32
    %c0_i32_0 = arith.constant 0 : i32
    %c0_i32_1 = arith.constant 0 : i32
    return %c0_i32, %c0_i32_0 : i32, i32
  }
  func.func @transform_5(%arg0: i32) -> (i32, i32) {
    %c0_i32 = arith.constant 0 : i32
    %c0_i32_0 = arith.constant 0 : i32
    return %arg0, %c0_i32 : i32, i32
  }
}

</mosaic_0001>

<bundles_post_ra>
// kernel: tpu_custom_call.1
= control target key start
LH: loop header
LB: loop body
LE: loop exit
PB: predicated region body
PF: predicated region fallthrough
CT: control target
= control target key end

     0   :  { %v188_v0 = vmov 0.0   ;;  %vm189_vm0 = vmmov 0   ;;  %vm38_vm1 = vcmask 130048   ;;  %vm107_vm2 = vcmask 261120   ;;  %s241_s1 = inlined_call_operand.vmem [shape: bf16[16,32], index: 1, kind: input, shape index: {}]   ;;  %s242_s0 = inlined_call_operand.vmem [shape: f32[8,16], index: 0, kind: input, shape index: {}]   ;;  %s243_s3 = inlined_call_operand.vmem [shape: bf16[32,4], index: 3, kind: input, shape index: {}]   ;;  %s244_s2 = inlined_call_operand.vmem [shape: f32[1,32], index: 2, kind: input, shape index: {}]   ;;  %s245_s4 = inlined_call_operand.vmem [shape: f32[1,4], index: 4, kind: input, shape index: {}]   ;;  %s246_s5 = inlined_call_operand.vmem [shape: f32[8,4], index: 5, kind: output, shape index: {}]  }
   0x1   :  { %169 = vmatprep.subr.bf16.mxu0 %v188_v0  ;;  %v185_v1 = vld [vmem:[%s241_s1] sm:$0xff]   ;;  %171 = vmatprep.mubr.msk.bf16.mxu0 %vm189_vm0, %v188_v0  ;;  %v187_v5 = vld [vmem:[%s243_s3 + $0x8] sm:$0xff]   ;;  %vm151_vm3 = vcmask 31744  }
   0x2   :  { %v21_v2 = vld [vmem:[%s242_s0] sm:$0xff]  ;;  %175 = vmatprep.subr.bf16.mxu1 %v188_v0  ;;  %179 = vmatprep.mubr.msk.bf16.mxu1 %vm189_vm0, %v188_v0 }
   0x3   :  { %170 = vmatpush3.bf16.msra.mxu0 %v185_v1  ;;  %v25_v3 = vpack.c.bf16 %v21_v2, %v21_v2  ;;  %v186_v4 = vld [vmem:[%s243_s3] sm:$0xff]  }
   0x4   :  { %176 = vmatpush3.bf16.msra.mxu1 %v186_v4  ;;  %v157_v6 = vld [vmem:[%s244_s2] ss:$0 sm:$0xff] }
   0x5   :  { %177 = vmatprep.subr.bf16.mxu1 %v188_v0  ;;  %v160_v14 = vld [vmem:[%s245_s4] ss:$0 sm:$0xff] }
   0x6   :  { %172 = vmatmul.mubr.msk.bf16.vlgmr.msra.gmra.mrb[0].mxu0 %vm38_vm1, %v25_v3 }
   0x8   :  { %178 = vmatpush3.bf16.msra.mxu1 %v187_v5 }
  0xd9   :  { %v76_v7 = vpop.f32.mrb[0].mxu0 }
  0xda   :  { %v77_v8 = vadd.f32 %v157_v6, %v76_v7  ;;  %v173_v9 = vpop.f32.mrb[1].mxu0 }
  0xdb   :  { %v79_v10 = vpop.f32.mrb[2].mxu0 }
  0xdc   :  { %v82_v11 = vmax.f32 %v77_v8, 0.0  ;;  %v174_v12 = vpop.f32.mrb[3].mxu0 }
  0xde   :  { %v88_v13 = vpack.c.bf16 %v82_v11, %v82_v11 }
  0xe0   :  { %180 = vmatmul.mubr.msk.bf16.vlgmr.msra.gmra.mrb[0].mxu1 %vm107_vm2, %v88_v13 }
 0x1b3   :  { %v145_v15 = vpop.f32.mrb[0].mxu1 }
 0x1b4   :  { %v146_v16 = vadd.f32 %v160_v14, %v145_v15  ;;  %v181_v17 = vpop.f32.mrb[1].mxu1 }
 0x1b5   :  { %v148_v18 = vpop.f32.mrb[2].mxu1 }
 0x1b6   :  { %152 = vst.msk [vmem:[%s246_s5] sm:$0xff] %vm151_vm3, %v146_v16  ;;  %v182_v19 = vpop.f32.mrb[3].mxu1 }

</bundles_post_ra>
